<compile_context>
chip_gen: v7x
topology: tpu7x:2x2x1
jax: 0.10.0
libtpu: 0.0.40
codegen_flags: <defaults>
</compile_context>

<pallas_src>
import functools

import numpy as np
import jax
import jax.numpy as jnp
from jax import lax
from jax.experimental import pallas as pl
from jax.experimental.pallas import tpu as pltpu


def _round_up(x, m):
    return ((x + m - 1) // m) * m


# ----------------------------------------------------------------------------
# Bilinear upsample (align_corners=True) as a single (Hin*Win, Hout*Wout) matrix.
# ----------------------------------------------------------------------------
def _interp_matrix_np(n_in: int, n_out: int) -> np.ndarray:
    """Row-interp matrix W s.t. out = W @ x matches nn.Upsample(bilinear,
    align_corners=True) along one axis."""
    W = np.zeros((n_out, n_in), dtype=np.float32)
    if n_out == 1 or n_in == 1:
        W[:, 0] = 1.0
        return W
    src = np.arange(n_out, dtype=np.float64) * (n_in - 1) / (n_out - 1)
    lo = np.clip(np.floor(src).astype(np.int64), 0, n_in - 2)
    frac = (src - lo).astype(np.float32)
    W[np.arange(n_out), lo] += 1.0 - frac
    W[np.arange(n_out), lo + 1] += frac
    return W


def _upsample_matrix(hin, win, hout, wout):
    """up_flat = x_flat @ M, with x_flat (C, hin*win), up_flat (C, hout*wout)."""
    wh = _interp_matrix_np(hin, hout)            # (hout, hin)
    ww = _interp_matrix_np(win, wout)            # (wout, win)
    return jnp.asarray(np.kron(wh, ww).T)        # (hin*win, hout*wout)


# ----------------------------------------------------------------------------
# Parameter folding: Conv2d + eval-mode BatchNorm2d -> im2col weights + bias.
# ----------------------------------------------------------------------------
def _fold_conv_bn(weight, conv_bias, gamma, beta, run_mean, run_var, *,
                  eps, cin_pad, cout_pad):
    cout, cin, K, _ = weight.shape
    s = gamma / jnp.sqrt(run_var + eps)                        # (cout,)
    w = weight * s[:, None, None, None]                        # BN scale folded in
    b = (conv_bias - run_mean) * s + beta                      # (cout,)
    w = jnp.pad(w, ((0, cout_pad - cout), (0, cin_pad - cin), (0, 0), (0, 0)))
    b = jnp.pad(b, (0, cout_pad - cout))
    # (cout_pad, cin_pad, K, K) -> (cout_pad, K*K*cin_pad) with column order
    # t*cin_pad + c where t = ki*K + kj (matches the in-kernel im2col staging).
    w_flat = jnp.transpose(w, (0, 2, 3, 1)).reshape(cout_pad, K * K * cin_pad)
    return w_flat, b.reshape(cout_pad, 1)


# ----------------------------------------------------------------------------
# In-kernel helpers.
# ----------------------------------------------------------------------------
def _stage_im2col(act_ref, cols_ref, cin, col_masks, *, H, W, K, halo):
    """Stage K*K shifted/masked slices of a flat-halo (cin, HW+2*halo)
    activation into cols_ref rows [0, K*K*cin).  Vertical zero padding comes
    from the zero halo gutters; horizontal wrap is masked via col_masks."""
    HW = H * W
    p = K // 2
    for ki in range(K):
        for kj in range(K):
            di, dj = ki - p, kj - p
            s = di * W + dj
            xs = act_ref[:, halo + s: halo + s + HW]           # (cin, HW)
            if dj != 0:
                xs = jnp.where(col_masks[dj], xs, 0.0)
            t = ki * K + kj
            cols_ref[t * cin:(t + 1) * cin, :] = xs


def _decoder_kernel(x1_ref, x2_ref, up_ref, w1_ref, b1_ref, w2_ref, b2_ref,
                    o_ref, cat_ref, h_ref, cols_ref, *,
                    H, W, K, C1, C2, halo):
    """Fused per-sample decoder: upsample + concat + conv1/BN/ReLU + conv2/BN/ReLU."""
    HW = H * W
    p = K // 2
    Ctot = C1 + C2
    cin1 = cat_ref.shape[0]      # conv1 padded input channels
    cin2 = h_ref.shape[0]        # conv2 padded input channels (= mid_pad)
    kkc1 = K * K * cin1
    kkc2 = K * K * cin2
    f32 = jnp.float32

    # Hoisted column-wrap validity masks (static per dj; vertical padding is
    # handled by the zero halo gutters so no row masks are needed).
    col = lax.broadcasted_iota(jnp.int32, (1, HW), 1) % W
    col_masks = {dj: (col + dj >= 0) & (col + dj < W)
                 for dj in range(-p, p + 1) if dj != 0}

    # Zero ONLY the halo gutters + channel-pad rows; the data slabs below are
    # fully overwritten each step.
    cat_ref[:, :halo] = jnp.zeros((cin1, halo), f32)
    cat_ref[:, halo + HW:] = jnp.zeros((cin1, halo), f32)
    h_ref[:, :halo] = jnp.zeros((cin2, halo), f32)
    h_ref[:, halo + HW:] = jnp.zeros((cin2, halo), f32)
    if cin1 > Ctot:
        cat_ref[Ctot:, halo:halo + HW] = jnp.zeros((cin1 - Ctot, HW), f32)

    # --- Bilinear upsample (align_corners=True) as ONE lane-dense matmul,
    #     fused with the channel concat, written straight into cat's data slab.
    cat_ref[:C1, halo:halo + HW] = jnp.dot(
        x1_ref[0], up_ref[...], preferred_element_type=f32)
    cat_ref[C1:Ctot, halo:halo + HW] = x2_ref[0].astype(f32)

    # --- conv1 + BN + ReLU: im2col staged once, a single MXU matmul.
    _stage_im2col(cat_ref, cols_ref, cin1, col_masks, H=H, W=W, K=K, halo=halo)
    h_act = jnp.maximum(
        jnp.dot(w1_ref[...], cols_ref[0:kkc1, :], preferred_element_type=f32)
        + b1_ref[...], 0.0)
    h_ref[:, halo:halo + HW] = h_act      # stays in VMEM; no HBM round trip

    # --- conv2 + BN + ReLU on the VMEM-resident h.
    _stage_im2col(h_ref, cols_ref, cin2, col_masks, H=H, W=W, K=K, halo=halo)
    o_ref[0] = jnp.maximum(
        jnp.dot(w2_ref[...], cols_ref[0:kkc2, :], preferred_element_type=f32)
        + b2_ref[...], 0.0).astype(o_ref.dtype)


# ----------------------------------------------------------------------------
# Decoder forward.
# ----------------------------------------------------------------------------
def decoder_forward(params, x1, x2, scale_factor, eps=1e-5):
    N, C1, Hin, Win = x1.shape
    N2, C2, H, W = x2.shape
    assert N == N2 and H == Hin * scale_factor and W == Win * scale_factor
    HW = H * W
    Ctot = C1 + C2

    w1_raw, w2_raw = params["conv1"][0], params["conv2"][0]
    K = w1_raw.shape[2]
    mid_chs, out_chs = w1_raw.shape[0], w2_raw.shape[0]
    assert w1_raw.shape[1] == Ctot and w2_raw.shape[1] == mid_chs

    cin1 = _round_up(Ctot, 8)           # sublane-aligned conv1 input channels
    mid_pad = _round_up(mid_chs, 8)     # sublane-aligned conv1 out / conv2 in
    out_pad = _round_up(out_chs, 8)
    kkc1 = K * K * cin1
    kkc2 = K * K * mid_pad
    halo = _round_up((K // 2) * (W + 1), 128)   # flat zero halo for tap slices
    HWp = HW + 2 * halo

    up_mat = _upsample_matrix(Hin, Win, H, W)                  # (Hin*Win, HW)
    w1, b1 = _fold_conv_bn(*params["conv1"], eps=eps, cin_pad=cin1,
                           cout_pad=mid_pad)
    w2, b2 = _fold_conv_bn(*params["conv2"], eps=eps, cin_pad=mid_pad,
                           cout_pad=out_pad)

    # Free reshapes (merge minor NCHW dims) -> (N, C, H*W) lane-flat layout.
    x1f = x1.reshape(N, C1, Hin * Win)
    x2f = x2.reshape(N, C2, HW)

    cost = pl.CostEstimate(
        flops=2 * N * HW * (C1 * Hin * Win + kkc1 * mid_pad + kkc2 * out_pad),
        transcendentals=0,
        bytes_accessed=4 * (x1f.size + x2f.size + up_mat.size + w1.size
                            + b1.size + w2.size + b2.size + N * out_pad * HW))

    kernel = functools.partial(_decoder_kernel, H=H, W=W, K=K,
                               C1=C1, C2=C2, halo=halo)

    out = pl.pallas_call(
        kernel,
        out_shape=jax.ShapeDtypeStruct((N, out_pad, HW), x1.dtype),
        grid=(N,),
        in_specs=[
            pl.BlockSpec((1, C1, Hin * Win), lambda n: (n, 0, 0)),
            pl.BlockSpec((1, C2, HW), lambda n: (n, 0, 0)),
            pl.BlockSpec((Hin * Win, HW), lambda n: (0, 0)),
            pl.BlockSpec((mid_pad, kkc1), lambda n: (0, 0)),
            pl.BlockSpec((mid_pad, 1), lambda n: (0, 0)),
            pl.BlockSpec((out_pad, kkc2), lambda n: (0, 0)),
            pl.BlockSpec((out_pad, 1), lambda n: (0, 0)),
        ],
        out_specs=pl.BlockSpec((1, out_pad, HW), lambda n: (n, 0, 0)),
        scratch_shapes=[
            pltpu.VMEM((cin1, HWp), jnp.float32),              # cat (flat halo)
            pltpu.VMEM((mid_pad, HWp), jnp.float32),           # h   (flat halo)
            pltpu.VMEM((max(kkc1, kkc2), HW), jnp.float32),    # shared im2col
        ],
        compiler_params=pltpu.CompilerParams(
            dimension_semantics=("parallel",)),
        cost_estimate=cost,
    )(x1f, x2f, up_mat, w1, b1, w2, b2)

    # Drop channel padding; restore NCHW only at the decoder output.
    return out[:, :out_chs, :].reshape(N, out_chs, H, W)


def init_decoder_params(key, in_chs, out_chs, kernel_size):
    mid_chs = (in_chs + out_chs) // 2

    def cbr_params(key, cin, cout):
        k1, k2, k3, k4 = jax.random.split(key, 4)
        w = jax.random.normal(k1, (cout, cin, kernel_size, kernel_size),
                              jnp.float32) * 0.1
        b = jax.random.normal(k2, (cout,), jnp.float32) * 0.05
        gamma = jax.random.uniform(k3, (cout,), jnp.float32, 0.5, 1.5)
        beta = jax.random.normal(k4, (cout,), jnp.float32) * 0.05
        run_mean = jnp.zeros((cout,), jnp.float32)   # PyTorch BN defaults
        run_var = jnp.ones((cout,), jnp.float32)
        return (w, b, gamma, beta, run_mean, run_var)

    k1, k2 = jax.random.split(key)
    return {"conv1": cbr_params(k1, in_chs, mid_chs),
            "conv2": cbr_params(k2, mid_chs, out_chs)}


# ----------------------------------------------------------------------------
# Pure-JAX reference (for correctness check).
# ----------------------------------------------------------------------------
def _ref_forward(params, x1, x2, scale_factor):
    N, C, Hin, Win = x1.shape
    wh = jnp.asarray(_interp_matrix_np(Hin, Hin * scale_factor))
    ww = jnp.asarray(_interp_matrix_np(Win, Win * scale_factor))
    up = jnp.einsum('nchw,Hh->ncHw', x1, wh)
    up = jnp.einsum('ncHw,Ww->ncHW', up, ww)
    cat = jnp.concatenate([up, x2], axis=1)

    def cbr(x, w, b, g, bt, rm, rv, eps=1e-5):
        p = w.shape[2] // 2
        y = jax.lax.conv_general_dilated(
            x, w, (1, 1), [(p, p), (p, p)],
            dimension_numbers=('NCHW', 'OIHW', 'NCHW'))
        y = y + b.reshape(1, -1, 1, 1)
        y = (g.reshape(1, -1, 1, 1) * (y - rm.reshape(1, -1, 1, 1))
             / jnp.sqrt(rv.reshape(1, -1, 1, 1) + eps) + bt.reshape(1, -1, 1, 1))
        return jnp.maximum(y, 0.0)

    h = cbr(cat, *params["conv1"])
    return cbr(h, *params["conv2"])


if __name__ == "__main__":
    # Decoder(in_chs=6, out_chs=4, kernel_size=3, padding=1, scale_factor=2)
    # x1: low-res features (to be upsampled), x2: skip connection.
    IN_CHS, OUT_CHS, KSIZE, SCALE = 6, 4, 3, 2
    key = jax.random.PRNGKey(0)
    kp, kx1, kx2 = jax.random.split(key, 3)

    x1 = jax.random.normal(kx1, (2, 4, 8, 8), jnp.float32)     # N, C1, H/2, W/2
    x2 = jax.random.normal(kx2, (2, 2, 16, 16), jnp.float32)   # N, C2, H,   W
    params = init_decoder_params(kp, IN_CHS, OUT_CHS, KSIZE)

    out = decoder_forward(params, x1, x2, SCALE)
    out = jax.block_until_ready(out)

    ref = jax.block_until_ready(_ref_forward(params, x1, x2, SCALE))
    assert out.shape == (2, OUT_CHS, 16, 16), out.shape
    if not np.allclose(np.asarray(out), np.asarray(ref), rtol=1e-3, atol=1e-3):
        raise AssertionError("Pallas Decoder output mismatch vs JAX reference")
    print("KERNEL_OK")
</pallas_src>

<mosaic_0001>
module attributes {stable_mosaic.version = 11 : i64} {
  func.func @_decoder_kernel(%arg0: i32, %arg1: memref<1x4x64xf32, #tpu.memory_space<vmem>>, %arg2: memref<1x2x256xf32, #tpu.memory_space<vmem>>, %arg3: memref<64x256xf32, #tpu.memory_space<vmem>>, %arg4: memref<8x72xf32, #tpu.memory_space<vmem>>, %arg5: memref<8x1xf32, #tpu.memory_space<vmem>>, %arg6: memref<8x72xf32, #tpu.memory_space<vmem>>, %arg7: memref<8x1xf32, #tpu.memory_space<vmem>>, %arg8: memref<1x8x256xf32, #tpu.memory_space<vmem>>, %arg9: memref<8x512xf32, #tpu.memory_space<vmem>>, %arg10: memref<8x512xf32, #tpu.memory_space<vmem>>, %arg11: memref<72x256xf32, #tpu.memory_space<vmem>>) attributes {dimension_semantics = [#tpu.dimension_semantics<parallel>], iteration_bounds = array<i64: 2>, scalar_prefetch = 0 : i64, scratch_operands = 3 : i64, tpu.core_type = #tpu.core_type<tc>, window_params = [{transform_indices = @transform_0, window_bounds = array<i64: 1, 4, 64>}, {transform_indices = @transform_1, window_bounds = array<i64: 1, 2, 256>}, {pipeline_mode = #tpu.pipeline_mode<synchronous>, transform_indices = @transform_2, window_bounds = array<i64: 64, 256>}, {pipeline_mode = #tpu.pipeline_mode<synchronous>, transform_indices = @transform_3, window_bounds = array<i64: 8, 72>}, {pipeline_mode = #tpu.pipeline_mode<synchronous>, transform_indices = @transform_4, window_bounds = array<i64: 8, 1>}, {pipeline_mode = #tpu.pipeline_mode<synchronous>, transform_indices = @transform_5, window_bounds = array<i64: 8, 72>}, {pipeline_mode = #tpu.pipeline_mode<synchronous>, transform_indices = @transform_6, window_bounds = array<i64: 8, 1>}, {transform_indices = @transform_7, window_bounds = array<i64: 1, 8, 256>}]} {
    %0 = tpu.iota {dimensions = array<i32: 1>} : vector<1x256xi32>
    %c16_i32 = arith.constant 16 : i32
    %c0_i32 = arith.constant 0 : i32
    %1 = arith.cmpi eq, %c16_i32, %c0_i32 : i32
    %c1_i32 = arith.constant 1 : i32
    %2 = arith.select %1, %c1_i32, %c16_i32 : i32
    %3 = vector.broadcast %2 : i32 to vector<1x256xi32>
    %4 = arith.remsi %0, %3 : vector<1x256xi32>
    %c0_i32_0 = arith.constant 0 : i32
    %5 = vector.broadcast %c0_i32_0 : i32 to vector<1x256xi32>
    %6 = arith.cmpi ne, %4, %5 : vector<1x256xi32>
    %c0_i32_1 = arith.constant 0 : i32
    %7 = vector.broadcast %c0_i32_1 : i32 to vector<1x256xi32>
    %8 = arith.cmpi slt, %4, %7 : vector<1x256xi32>
    %c0_i32_2 = arith.constant 0 : i32
    %9 = arith.cmpi slt, %2, %c0_i32_2 : i32
    %10 = vector.broadcast %9 : i1 to vector<1x256xi1>
    %11 = vector.broadcast %10 : vector<1x256xi1> to vector<1x256xi1>
    %12 = arith.xori %8, %11 : vector<1x256xi1>
    %13 = arith.andi %12, %6 : vector<1x256xi1>
    %14 = vector.broadcast %2 : i32 to vector<1x256xi32>
    %15 = arith.addi %4, %14 : vector<1x256xi32>
    %16 = arith.select %13, %15, %4 : vector<1x256xi1>, vector<1x256xi32>
    %c-1_i32 = arith.constant -1 : i32
    %17 = vector.broadcast %c-1_i32 : i32 to vector<1x256xi32>
    %18 = arith.addi %16, %17 : vector<1x256xi32>
    %c0_i32_3 = arith.constant 0 : i32
    %19 = vector.broadcast %c0_i32_3 : i32 to vector<1x256xi32>
    %20 = arith.cmpi sge, %18, %19 : vector<1x256xi32>
    %c-1_i32_4 = arith.constant -1 : i32
    %21 = vector.broadcast %c-1_i32_4 : i32 to vector<1x256xi32>
    %22 = arith.addi %16, %21 : vector<1x256xi32>
    %c16_i32_5 = arith.constant 16 : i32
    %23 = vector.broadcast %c16_i32_5 : i32 to vector<1x256xi32>
    %24 = arith.cmpi slt, %22, %23 : vector<1x256xi32>
    %25 = arith.andi %20, %24 : vector<1x256xi1>
    %c1_i32_6 = arith.constant 1 : i32
    %26 = vector.broadcast %c1_i32_6 : i32 to vector<1x256xi32>
    %27 = arith.addi %16, %26 : vector<1x256xi32>
    %c0_i32_7 = arith.constant 0 : i32
    %28 = vector.broadcast %c0_i32_7 : i32 to vector<1x256xi32>
    %29 = arith.cmpi sge, %27, %28 : vector<1x256xi32>
    %c1_i32_8 = arith.constant 1 : i32
    %30 = vector.broadcast %c1_i32_8 : i32 to vector<1x256xi32>
    %31 = arith.addi %16, %30 : vector<1x256xi32>
    %c16_i32_9 = arith.constant 16 : i32
    %32 = vector.broadcast %c16_i32_9 : i32 to vector<1x256xi32>
    %33 = arith.cmpi slt, %31, %32 : vector<1x256xi32>
    %34 = arith.andi %29, %33 : vector<1x256xi1>
    %cst = arith.constant 0.000000e+00 : f32
    %35 = vector.broadcast %cst : f32 to vector<8x128xf32>
    %c0 = arith.constant 0 : index
    %c0_10 = arith.constant 0 : index
    %36 = vector.load %arg9[%c0, %c0_10] : memref<8x512xf32, #tpu.memory_space<vmem>>, vector<8x128xf32>
    tpu.vector_store %arg9[%c0, %c0_10], %35 {strides = array<i32>} : memref<8x512xf32, #tpu.memory_space<vmem>>, vector<8x128xf32>,
    %cst_11 = arith.constant 0.000000e+00 : f32
    %37 = vector.broadcast %cst_11 : f32 to vector<8x128xf32>
    %c0_12 = arith.constant 0 : index
    %c384 = arith.constant 384 : index
    %38 = vector.load %arg9[%c0_12, %c384] : memref<8x512xf32, #tpu.memory_space<vmem>>, vector<8x128xf32>
    tpu.vector_store %arg9[%c0_12, %c384], %37 {strides = array<i32>} : memref<8x512xf32, #tpu.memory_space<vmem>>, vector<8x128xf32>,
    %cst_13 = arith.constant 0.000000e+00 : f32
    %39 = vector.broadcast %cst_13 : f32 to vector<8x128xf32>
    %c0_14 = arith.constant 0 : index
    %c0_15 = arith.constant 0 : index
    %40 = vector.load %arg10[%c0_14, %c0_15] : memref<8x512xf32, #tpu.memory_space<vmem>>, vector<8x128xf32>
    tpu.vector_store %arg10[%c0_14, %c0_15], %39 {strides = array<i32>} : memref<8x512xf32, #tpu.memory_space<vmem>>, vector<8x128xf32>,
    %cst_16 = arith.constant 0.000000e+00 : f32
    %41 = vector.broadcast %cst_16 : f32 to vector<8x128xf32>
    %c0_17 = arith.constant 0 : index
    %c384_18 = arith.constant 384 : index
    %42 = vector.load %arg10[%c0_17, %c384_18] : memref<8x512xf32, #tpu.memory_space<vmem>>, vector<8x128xf32>
    tpu.vector_store %arg10[%c0_17, %c384_18], %41 {strides = array<i32>} : memref<8x512xf32, #tpu.memory_space<vmem>>, vector<8x128xf32>,
    %cst_19 = arith.constant 0.000000e+00 : f32
    %43 = vector.broadcast %cst_19 : f32 to vector<2x256xf32>
    %c6 = arith.constant 6 : index
    %c128 = arith.constant 128 : index
    %44 = vector.load %arg9[%c6, %c128] : memref<8x512xf32, #tpu.memory_space<vmem>>, vector<2x256xf32>
    tpu.vector_store %arg9[%c6, %c128], %43 {strides = array<i32>} : memref<8x512xf32, #tpu.memory_space<vmem>>, vector<2x256xf32>,
    %c0_20 = arith.constant 0 : index
    %c0_21 = arith.constant 0 : index
    %c0_22 = arith.constant 0 : index
    %45 = vector.load %arg1[%c0_20, %c0_21, %c0_22] : memref<1x4x64xf32, #tpu.memory_space<vmem>>, vector<1x4x64xf32>
    %46 = vector.shape_cast %45 : vector<1x4x64xf32> to vector<4x64xf32>
    %c0_23 = arith.constant 0 : index
    %c0_24 = arith.constant 0 : index
    %47 = vector.load %arg3[%c0_23, %c0_24] : memref<64x256xf32, #tpu.memory_space<vmem>>, vector<64x256xf32>
    %cst_25 = arith.constant dense<0.000000e+00> : vector<4x256xf32>
    %48 = tpu.matmul %46, %47, %cst_25 {dimension_numbers = #tpu.dot_dimension_numbers<[1], [0], [0], [1], [0, 0, 1, 1], [], []>} : vector<4x64xf32>, vector<64x256xf32>, vector<4x256xf32> -> vector<4x256xf32>
    %c0_26 = arith.constant 0 : index
    %c128_27 = arith.constant 128 : index
    %49 = vector.load %arg9[%c0_26, %c128_27] : memref<8x512xf32, #tpu.memory_space<vmem>>, vector<4x256xf32>
    tpu.vector_store %arg9[%c0_26, %c128_27], %48 {strides = array<i32>} : memref<8x512xf32, #tpu.memory_space<vmem>>, vector<4x256xf32>,
    %c0_28 = arith.constant 0 : index
    %c0_29 = arith.constant 0 : index
    %c0_30 = arith.constant 0 : index
    %50 = vector.load %arg2[%c0_28, %c0_29, %c0_30] : memref<1x2x256xf32, #tpu.memory_space<vmem>>, vector<1x2x256xf32>
    %51 = vector.shape_cast %50 : vector<1x2x256xf32> to vector<2x256xf32>
    %c4 = arith.constant 4 : index
    %c128_31 = arith.constant 128 : index
    %52 = vector.load %arg9[%c4, %c128_31] : memref<8x512xf32, #tpu.memory_space<vmem>>, vector<2x256xf32>
    tpu.vector_store %arg9[%c4, %c128_31], %51 {strides = array<i32>} : memref<8x512xf32, #tpu.memory_space<vmem>>, vector<2x256xf32>,
    %c0_32 = arith.constant 0 : index
    %c111 = arith.constant 111 : index
    %53 = vector.load %arg9[%c0_32, %c111] : memref<8x512xf32, #tpu.memory_space<vmem>>, vector<8x256xf32>
    %cst_33 = arith.constant 0.000000e+00 : f32
    %54 = vector.shape_cast %25 : vector<1x256xi1> to vector<1x256xi1>
    %55 = vector.broadcast %54 : vector<1x256xi1> to vector<8x256xi1>
    %56 = vector.broadcast %cst_33 : f32 to vector<8x256xf32>
    %57 = arith.select %55, %53, %56 : vector<8x256xi1>, vector<8x256xf32>
    %c0_34 = arith.constant 0 : index
    %c0_35 = arith.constant 0 : index
    %58 = vector.load %arg11[%c0_34, %c0_35] : memref<72x256xf32, #tpu.memory_space<vmem>>, vector<8x256xf32>
    tpu.vector_store %arg11[%c0_34, %c0_35], %57 {strides = array<i32>} : memref<72x256xf32, #tpu.memory_space<vmem>>, vector<8x256xf32>,
    %c0_36 = arith.constant 0 : index
    %c112 = arith.constant 112 : index
    %59 = vector.load %arg9[%c0_36, %c112] : memref<8x512xf32, #tpu.memory_space<vmem>>, vector<8x256xf32>
    %c8 = arith.constant 8 : index
    %c0_37 = arith.constant 0 : index
    %60 = vector.load %arg11[%c8, %c0_37] : memref<72x256xf32, #tpu.memory_space<vmem>>, vector<8x256xf32>
    tpu.vector_store %arg11[%c8, %c0_37], %59 {strides = array<i32>} : memref<72x256xf32, #tpu.memory_space<vmem>>, vector<8x256xf32>,
    %c0_38 = arith.constant 0 : index
    %c113 = arith.constant 113 : index
    %61 = vector.load %arg9[%c0_38, %c113] : memref<8x512xf32, #tpu.memory_space<vmem>>, vector<8x256xf32>
    %cst_39 = arith.constant 0.000000e+00 : f32
    %62 = vector.shape_cast %34 : vector<1x256xi1> to vector<1x256xi1>
    %63 = vector.broadcast %62 : vector<1x256xi1> to vector<8x256xi1>
    %64 = vector.broadcast %cst_39 : f32 to vector<8x256xf32>
    %65 = arith.select %63, %61, %64 : vector<8x256xi1>, vector<8x256xf32>
    %c16 = arith.constant 16 : index
    %c0_40 = arith.constant 0 : index
    %66 = vector.load %arg11[%c16, %c0_40] : memref<72x256xf32, #tpu.memory_space<vmem>>, vector<8x256xf32>
    tpu.vector_store %arg11[%c16, %c0_40], %65 {strides = array<i32>} : memref<72x256xf32, #tpu.memory_space<vmem>>, vector<8x256xf32>,
    %c0_41 = arith.constant 0 : index
    %c127 = arith.constant 127 : index
    %67 = vector.load %arg9[%c0_41, %c127] : memref<8x512xf32, #tpu.memory_space<vmem>>, vector<8x256xf32>
    %cst_42 = arith.constant 0.000000e+00 : f32
    %68 = vector.shape_cast %25 : vector<1x256xi1> to vector<1x256xi1>
    %69 = vector.broadcast %68 : vector<1x256xi1> to vector<8x256xi1>
    %70 = vector.broadcast %cst_42 : f32 to vector<8x256xf32>
    %71 = arith.select %69, %67, %70 : vector<8x256xi1>, vector<8x256xf32>
    %c24 = arith.constant 24 : index
    %c0_43 = arith.constant 0 : index
    %72 = vector.load %arg11[%c24, %c0_43] : memref<72x256xf32, #tpu.memory_space<vmem>>, vector<8x256xf32>
    tpu.vector_store %arg11[%c24, %c0_43], %71 {strides = array<i32>} : memref<72x256xf32, #tpu.memory_space<vmem>>, vector<8x256xf32>,
    %c0_44 = arith.constant 0 : index
    %c128_45 = arith.constant 128 : index
    %73 = vector.load %arg9[%c0_44, %c128_45] : memref<8x512xf32, #tpu.memory_space<vmem>>, vector<8x256xf32>
    %c32 = arith.constant 32 : index
    %c0_46 = arith.constant 0 : index
    %74 = vector.load %arg11[%c32, %c0_46] : memref<72x256xf32, #tpu.memory_space<vmem>>, vector<8x256xf32>
    tpu.vector_store %arg11[%c32, %c0_46], %73 {strides = array<i32>} : memref<72x256xf32, #tpu.memory_space<vmem>>, vector<8x256xf32>,
    %c0_47 = arith.constant 0 : index
    %c129 = arith.constant 129 : index
    %75 = vector.load %arg9[%c0_47, %c129] : memref<8x512xf32, #tpu.memory_space<vmem>>, vector<8x256xf32>
    %cst_48 = arith.constant 0.000000e+00 : f32
    %76 = vector.shape_cast %34 : vector<1x256xi1> to vector<1x256xi1>
    %77 = vector.broadcast %76 : vector<1x256xi1> to vector<8x256xi1>
    %78 = vector.broadcast %cst_48 : f32 to vector<8x256xf32>
    %79 = arith.select %77, %75, %78 : vector<8x256xi1>, vector<8x256xf32>
    %c40 = arith.constant 40 : index
    %c0_49 = arith.constant 0 : index
    %80 = vector.load %arg11[%c40, %c0_49] : memref<72x256xf32, #tpu.memory_space<vmem>>, vector<8x256xf32>
    tpu.vector_store %arg11[%c40, %c0_49], %79 {strides = array<i32>} : memref<72x256xf32, #tpu.memory_space<vmem>>, vector<8x256xf32>,
    %c0_50 = arith.constant 0 : index
    %c143 = arith.constant 143 : index
    %81 = vector.load %arg9[%c0_50, %c143] : memref<8x512xf32, #tpu.memory_space<vmem>>, vector<8x256xf32>
    %cst_51 = arith.constant 0.000000e+00 : f32
    %82 = vector.shape_cast %25 : vector<1x256xi1> to vector<1x256xi1>
    %83 = vector.broadcast %82 : vector<1x256xi1> to vector<8x256xi1>
    %84 = vector.broadcast %cst_51 : f32 to vector<8x256xf32>
    %85 = arith.select %83, %81, %84 : vector<8x256xi1>, vector<8x256xf32>
    %c48 = arith.constant 48 : index
    %c0_52 = arith.constant 0 : index
    %86 = vector.load %arg11[%c48, %c0_52] : memref<72x256xf32, #tpu.memory_space<vmem>>, vector<8x256xf32>
    tpu.vector_store %arg11[%c48, %c0_52], %85 {strides = array<i32>} : memref<72x256xf32, #tpu.memory_space<vmem>>, vector<8x256xf32>,
    %c0_53 = arith.constant 0 : index
    %c144 = arith.constant 144 : index
    %87 = vector.load %arg9[%c0_53, %c144] : memref<8x512xf32, #tpu.memory_space<vmem>>, vector<8x256xf32>
    %c56 = arith.constant 56 : index
    %c0_54 = arith.constant 0 : index
    %88 = vector.load %arg11[%c56, %c0_54] : memref<72x256xf32, #tpu.memory_space<vmem>>, vector<8x256xf32>
    tpu.vector_store %arg11[%c56, %c0_54], %87 {strides = array<i32>} : memref<72x256xf32, #tpu.memory_space<vmem>>, vector<8x256xf32>,
    %c0_55 = arith.constant 0 : index
    %c145 = arith.constant 145 : index
    %89 = vector.load %arg9[%c0_55, %c145] : memref<8x512xf32, #tpu.memory_space<vmem>>, vector<8x256xf32>
    %cst_56 = arith.constant 0.000000e+00 : f32
    %90 = vector.shape_cast %34 : vector<1x256xi1> to vector<1x256xi1>
    %91 = vector.broadcast %90 : vector<1x256xi1> to vector<8x256xi1>
    %92 = vector.broadcast %cst_56 : f32 to vector<8x256xf32>
    %93 = arith.select %91, %89, %92 : vector<8x256xi1>, vector<8x256xf32>
    %c64 = arith.constant 64 : index
    %c0_57 = arith.constant 0 : index
    %94 = vector.load %arg11[%c64, %c0_57] : memref<72x256xf32, #tpu.memory_space<vmem>>, vector<8x256xf32>
    tpu.vector_store %arg11[%c64, %c0_57], %93 {strides = array<i32>} : memref<72x256xf32, #tpu.memory_space<vmem>>, vector<8x256xf32>,
    %c0_58 = arith.constant 0 : index
    %c0_59 = arith.constant 0 : index
    %95 = vector.load %arg4[%c0_58, %c0_59] : memref<8x72xf32, #tpu.memory_space<vmem>>, vector<8x72xf32>
    %c0_60 = arith.constant 0 : index
    %c0_61 = arith.constant 0 : index
    %96 = vector.load %arg11[%c0_60, %c0_61] : memref<72x256xf32, #tpu.memory_space<vmem>>, vector<72x256xf32>
    %cst_62 = arith.constant dense<0.000000e+00> : vector<8x256xf32>
    %97 = tpu.matmul %95, %96, %cst_62 {dimension_numbers = #tpu.dot_dimension_numbers<[1], [0], [0], [1], [0, 0, 1, 1], [], []>} : vector<8x72xf32>, vector<72x256xf32>, vector<8x256xf32> -> vector<8x256xf32>
    %c0_63 = arith.constant 0 : index
    %c0_64 = arith.constant 0 : index
    %98 = vector.load %arg5[%c0_63, %c0_64] : memref<8x1xf32, #tpu.memory_space<vmem>>, vector<8x1xf32>
    %99 = vector.broadcast %98 : vector<8x1xf32> to vector<8x256xf32>
    %100 = arith.addf %97, %99 : vector<8x256xf32>
    %cst_65 = arith.constant 0.000000e+00 : f32
    %101 = vector.broadcast %cst_65 : f32 to vector<8x256xf32>
    %102 = arith.maximumf %100, %101 : vector<8x256xf32>
    %c0_66 = arith.constant 0 : index
    %c128_67 = arith.constant 128 : index
    %103 = vector.load %arg10[%c0_66, %c128_67] : memref<8x512xf32, #tpu.memory_space<vmem>>, vector<8x256xf32>
    tpu.vector_store %arg10[%c0_66, %c128_67], %102 {strides = array<i32>} : memref<8x512xf32, #tpu.memory_space<vmem>>, vector<8x256xf32>,
    %c0_68 = arith.constant 0 : index
    %c111_69 = arith.constant 111 : index
    %104 = vector.load %arg10[%c0_68, %c111_69] : memref<8x512xf32, #tpu.memory_space<vmem>>, vector<8x256xf32>
    %cst_70 = arith.constant 0.000000e+00 : f32
    %105 = vector.shape_cast %25 : vector<1x256xi1> to vector<1x256xi1>
    %106 = vector.broadcast %105 : vector<1x256xi1> to vector<8x256xi1>
    %107 = vector.broadcast %cst_70 : f32 to vector<8x256xf32>
    %108 = arith.select %106, %104, %107 : vector<8x256xi1>, vector<8x256xf32>
    %c0_71 = arith.constant 0 : index
    %c0_72 = arith.constant 0 : index
    %109 = vector.load %arg11[%c0_71, %c0_72] : memref<72x256xf32, #tpu.memory_space<vmem>>, vector<8x256xf32>
    tpu.vector_store %arg11[%c0_71, %c0_72], %108 {strides = array<i32>} : memref<72x256xf32, #tpu.memory_space<vmem>>, vector<8x256xf32>,
    %c0_73 = arith.constant 0 : index
    %c112_74 = arith.constant 112 : index
    %110 = vector.load %arg10[%c0_73, %c112_74] : memref<8x512xf32, #tpu.memory_space<vmem>>, vector<8x256xf32>
    %c8_75 = arith.constant 8 : index
    %c0_76 = arith.constant 0 : index
    %111 = vector.load %arg11[%c8_75, %c0_76] : memref<72x256xf32, #tpu.memory_space<vmem>>, vector<8x256xf32>
    tpu.vector_store %arg11[%c8_75, %c0_76], %110 {strides = array<i32>} : memref<72x256xf32, #tpu.memory_space<vmem>>, vector<8x256xf32>,
    %c0_77 = arith.constant 0 : index
    %c113_78 = arith.constant 113 : index
    %112 = vector.load %arg10[%c0_77, %c113_78] : memref<8x512xf32, #tpu.memory_space<vmem>>, vector<8x256xf32>
    %cst_79 = arith.constant 0.000000e+00 : f32
    %113 = vector.shape_cast %34 : vector<1x256xi1> to vector<1x256xi1>
    %114 = vector.broadcast %113 : vector<1x256xi1> to vector<8x256xi1>
    %115 = vector.broadcast %cst_79 : f32 to vector<8x256xf32>
    %116 = arith.select %114, %112, %115 : vector<8x256xi1>, vector<8x256xf32>
    %c16_80 = arith.constant 16 : index
    %c0_81 = arith.constant 0 : index
    %117 = vector.load %arg11[%c16_80, %c0_81] : memref<72x256xf32, #tpu.memory_space<vmem>>, vector<8x256xf32>
    tpu.vector_store %arg11[%c16_80, %c0_81], %116 {strides = array<i32>} : memref<72x256xf32, #tpu.memory_space<vmem>>, vector<8x256xf32>,
    %c0_82 = arith.constant 0 : index
    %c127_83 = arith.constant 127 : index
    %118 = vector.load %arg10[%c0_82, %c127_83] : memref<8x512xf32, #tpu.memory_space<vmem>>, vector<8x256xf32>
    %cst_84 = arith.constant 0.000000e+00 : f32
    %119 = vector.shape_cast %25 : vector<1x256xi1> to vector<1x256xi1>
    %120 = vector.broadcast %119 : vector<1x256xi1> to vector<8x256xi1>
    %121 = vector.broadcast %cst_84 : f32 to vector<8x256xf32>
    %122 = arith.select %120, %118, %121 : vector<8x256xi1>, vector<8x256xf32>
    %c24_85 = arith.constant 24 : index
    %c0_86 = arith.constant 0 : index
    %123 = vector.load %arg11[%c24_85, %c0_86] : memref<72x256xf32, #tpu.memory_space<vmem>>, vector<8x256xf32>
    tpu.vector_store %arg11[%c24_85, %c0_86], %122 {strides = array<i32>} : memref<72x256xf32, #tpu.memory_space<vmem>>, vector<8x256xf32>,
    %c0_87 = arith.constant 0 : index
    %c128_88 = arith.constant 128 : index
    %124 = vector.load %arg10[%c0_87, %c128_88] : memref<8x512xf32, #tpu.memory_space<vmem>>, vector<8x256xf32>
    %c32_89 = arith.constant 32 : index
    %c0_90 = arith.constant 0 : index
    %125 = vector.load %arg11[%c32_89, %c0_90] : memref<72x256xf32, #tpu.memory_space<vmem>>, vector<8x256xf32>
    tpu.vector_store %arg11[%c32_89, %c0_90], %124 {strides = array<i32>} : memref<72x256xf32, #tpu.memory_space<vmem>>, vector<8x256xf32>,
    %c0_91 = arith.constant 0 : index
    %c129_92 = arith.constant 129 : index
    %126 = vector.load %arg10[%c0_91, %c129_92] : memref<8x512xf32, #tpu.memory_space<vmem>>, vector<8x256xf32>
    %cst_93 = arith.constant 0.000000e+00 : f32
    %127 = vector.shape_cast %34 : vector<1x256xi1> to vector<1x256xi1>
    %128 = vector.broadcast %127 : vector<1x256xi1> to vector<8x256xi1>
    %129 = vector.broadcast %cst_93 : f32 to vector<8x256xf32>
    %130 = arith.select %128, %126, %129 : vector<8x256xi1>, vector<8x256xf32>
    %c40_94 = arith.constant 40 : index
    %c0_95 = arith.constant 0 : index
    %131 = vector.load %arg11[%c40_94, %c0_95] : memref<72x256xf32, #tpu.memory_space<vmem>>, vector<8x256xf32>
    tpu.vector_store %arg11[%c40_94, %c0_95], %130 {strides = array<i32>} : memref<72x256xf32, #tpu.memory_space<vmem>>, vector<8x256xf32>,
    %c0_96 = arith.constant 0 : index
    %c143_97 = arith.constant 143 : index
    %132 = vector.load %arg10[%c0_96, %c143_97] : memref<8x512xf32, #tpu.memory_space<vmem>>, vector<8x256xf32>
    %cst_98 = arith.constant 0.000000e+00 : f32
    %133 = vector.shape_cast %25 : vector<1x256xi1> to vector<1x256xi1>
    %134 = vector.broadcast %133 : vector<1x256xi1> to vector<8x256xi1>
    %135 = vector.broadcast %cst_98 : f32 to vector<8x256xf32>
    %136 = arith.select %134, %132, %135 : vector<8x256xi1>, vector<8x256xf32>
    %c48_99 = arith.constant 48 : index
    %c0_100 = arith.constant 0 : index
    %137 = vector.load %arg11[%c48_99, %c0_100] : memref<72x256xf32, #tpu.memory_space<vmem>>, vector<8x256xf32>
    tpu.vector_store %arg11[%c48_99, %c0_100], %136 {strides = array<i32>} : memref<72x256xf32, #tpu.memory_space<vmem>>, vector<8x256xf32>,
    %c0_101 = arith.constant 0 : index
    %c144_102 = arith.constant 144 : index
    %138 = vector.load %arg10[%c0_101, %c144_102] : memref<8x512xf32, #tpu.memory_space<vmem>>, vector<8x256xf32>
    %c56_103 = arith.constant 56 : index
    %c0_104 = arith.constant 0 : index
    %139 = vector.load %arg11[%c56_103, %c0_104] : memref<72x256xf32, #tpu.memory_space<vmem>>, vector<8x256xf32>
    tpu.vector_store %arg11[%c56_103, %c0_104], %138 {strides = array<i32>} : memref<72x256xf32, #tpu.memory_space<vmem>>, vector<8x256xf32>,
    %c0_105 = arith.constant 0 : index
    %c145_106 = arith.constant 145 : index
    %140 = vector.load %arg10[%c0_105, %c145_106] : memref<8x512xf32, #tpu.memory_space<vmem>>, vector<8x256xf32>
    %cst_107 = arith.constant 0.000000e+00 : f32
    %141 = vector.shape_cast %34 : vector<1x256xi1> to vector<1x256xi1>
    %142 = vector.broadcast %141 : vector<1x256xi1> to vector<8x256xi1>
    %143 = vector.broadcast %cst_107 : f32 to vector<8x256xf32>
    %144 = arith.select %142, %140, %143 : vector<8x256xi1>, vector<8x256xf32>
    %c64_108 = arith.constant 64 : index
    %c0_109 = arith.constant 0 : index
    %145 = vector.load %arg11[%c64_108, %c0_109] : memref<72x256xf32, #tpu.memory_space<vmem>>, vector<8x256xf32>
    tpu.vector_store %arg11[%c64_108, %c0_109], %144 {strides = array<i32>} : memref<72x256xf32, #tpu.memory_space<vmem>>, vector<8x256xf32>,
    %c0_110 = arith.constant 0 : index
    %c0_111 = arith.constant 0 : index
    %146 = vector.load %arg6[%c0_110, %c0_111] : memref<8x72xf32, #tpu.memory_space<vmem>>, vector<8x72xf32>
    %c0_112 = arith.constant 0 : index
    %c0_113 = arith.constant 0 : index
    %147 = vector.load %arg11[%c0_112, %c0_113] : memref<72x256xf32, #tpu.memory_space<vmem>>, vector<72x256xf32>
    %cst_114 = arith.constant dense<0.000000e+00> : vector<8x256xf32>
    %148 = tpu.matmul %146, %147, %cst_114 {dimension_numbers = #tpu.dot_dimension_numbers<[1], [0], [0], [1], [0, 0, 1, 1], [], []>} : vector<8x72xf32>, vector<72x256xf32>, vector<8x256xf32> -> vector<8x256xf32>
    %c0_115 = arith.constant 0 : index
    %c0_116 = arith.constant 0 : index
    %149 = vector.load %arg7[%c0_115, %c0_116] : memref<8x1xf32, #tpu.memory_space<vmem>>, vector<8x1xf32>
    %150 = vector.broadcast %149 : vector<8x1xf32> to vector<8x256xf32>
    %151 = arith.addf %148, %150 : vector<8x256xf32>
    %cst_117 = arith.constant 0.000000e+00 : f32
    %152 = vector.broadcast %cst_117 : f32 to vector<8x256xf32>
    %153 = arith.maximumf %151, %152 : vector<8x256xf32>
    %c0_118 = arith.constant 0 : index
    %c0_119 = arith.constant 0 : index
    %c0_120 = arith.constant 0 : index
    %154 = vector.load %arg8[%c0_118, %c0_119, %c0_120] : memref<1x8x256xf32, #tpu.memory_space<vmem>>, vector<1x8x256xf32>
    %155 = vector.shape_cast %154 : vector<1x8x256xf32> to vector<8x256xf32>
    %156 = vector.shape_cast %153 : vector<8x256xf32> to vector<1x8x256xf32>
    tpu.vector_store %arg8[%c0_118, %c0_119, %c0_120], %156 {strides = array<i32>} : memref<1x8x256xf32, #tpu.memory_space<vmem>>, vector<1x8x256xf32>,
    return
  }
  func.func @transform_0(%arg0: i32) -> (i32, i32, i32) {
    %c0_i32 = arith.constant 0 : i32
    %c0_i32_0 = arith.constant 0 : i32
    %c0_i32_1 = arith.constant 0 : i32
    return %arg0, %c0_i32, %c0_i32_0 : i32, i32, i32
  }
  func.func @transform_1(%arg0: i32) -> (i32, i32, i32) {
    %c0_i32 = arith.constant 0 : i32
    %c0_i32_0 = arith.constant 0 : i32
    %c0_i32_1 = arith.constant 0 : i32
    return %arg0, %c0_i32, %c0_i32_0 : i32, i32, i32
  }
  func.func @transform_2(%arg0: i32) -> (i32, i32) {
    %c0_i32 = arith.constant 0 : i32
    %c0_i32_0 = arith.constant 0 : i32
    %c0_i32_1 = arith.constant 0 : i32
    return %c0_i32, %c0_i32_0 : i32, i32
  }
  func.func @transform_3(%arg0: i32) -> (i32, i32) {
    %c0_i32 = arith.constant 0 : i32
    %c0_i32_0 = arith.constant 0 : i32
    %c0_i32_1 = arith.constant 0 : i32
    return %c0_i32, %c0_i32_0 : i32, i32
  }
  func.func @transform_4(%arg0: i32) -> (i32, i32) {
    %c0_i32 = arith.constant 0 : i32
    %c0_i32_0 = arith.constant 0 : i32
    %c0_i32_1 = arith.constant 0 : i32
    return %c0_i32, %c0_i32_0 : i32, i32
  }
  func.func @transform_5(%arg0: i32) -> (i32, i32) {
    %c0_i32 = arith.constant 0 : i32
    %c0_i32_0 = arith.constant 0 : i32
    %c0_i32_1 = arith.constant 0 : i32
    return %c0_i32, %c0_i32_0 : i32, i32
  }
  func.func @transform_6(%arg0: i32) -> (i32, i32) {
    %c0_i32 = arith.constant 0 : i32
    %c0_i32_0 = arith.constant 0 : i32
    %c0_i32_1 = arith.constant 0 : i32
    return %c0_i32, %c0_i32_0 : i32, i32
  }
  func.func @transform_7(%arg0: i32) -> (i32, i32, i32) {
    %c0_i32 = arith.constant 0 : i32
    %c0_i32_0 = arith.constant 0 : i32
    %c0_i32_1 = arith.constant 0 : i32
    return %arg0, %c0_i32, %c0_i32_0 : i32, i32, i32
  }
}

</mosaic_0001>

<bundles_post_ra>
// kernel: tpu_custom_call.1
= control target key start
LH: loop header
LB: loop body
LE: loop exit
PB: predicated region body
PF: predicated region fallthrough
CT: control target
= control target key end

     0   :  { %12 = vsyncpa [#allocation6], 0  ;;  %s1854_s0 = inlined_call_operand.vmem [shape: f32[2,4,64], index: 0, kind: input, shape index: {}]   ;;  %s1855_s1 = inlined_call_operand.vmem [shape: f32[2,2,256], index: 1, kind: input, shape index: {}]   ;;  %s1856_s2 = inlined_call_operand.hbm [shape: f32[64,256], index: 2, kind: input, shape index: {}]   ;;  %s1857_s3 = inlined_call_operand.vmem [shape: f32[8,72], index: 3, kind: input, shape index: {}]   ;;  %s1858_s4 = inlined_call_operand.vmem [shape: f32[8,1], index: 4, kind: input, shape index: {}]   ;;  %s1859_s5 = inlined_call_operand.vmem [shape: f32[8,72], index: 5, kind: input, shape index: {}]   ;;  %s1860_s6 = inlined_call_operand.vmem [shape: f32[8,1], index: 6, kind: input, shape index: {}]   ;;  %s1861_s7 = inlined_call_operand.hbm [shape: f32[2,8,256], index: 7, kind: output, shape index: {}]  }
   0x1   :  { %13 = vsyncpa [#allocation7], 0 }
   0x2   :  { %15 = vsyncpa [#allocation7 + $0x1], 0  ;;  %s1502_s24 = smov 0   ;;  %s1504_s25 = smov 0  }
   0x3   :  { %s1506_s26 = smov 0   ;;  %s1508_s27 = smov 0  }
   0x4 LB: > { %s1523_s28 = sadd.s32 4294967295, %s1445_s27   ;;  %s1107_s29 = sadd.s32 4294967294, %s1445_s27   ;;  %s1445_s27 = sphi %s1508_s27, %s1892_s27   ;;  %s1441_s26 = sphi %s1506_s26, %s1891_s26   ;;  %s1437_s25 = sphi %s1504_s25, %s1890_s25   ;;  %s1433_s24 = sphi %s1502_s24, %s1889_s24  }
   0x5   : > { %s1527_s30 = sadd.s32 1, %s1445_s27   ;;  %s185_s8 = sadd.s32 1, %s1441_s26 }
   0x6   : > { %s182_s9 = ssub.s32 %s1445_s27, %s1527_s30  ;;  %p195_p0 = scmp.ne.s32.totalorder %s1441_s26, %s1437_s25 }
   0x7   : > { %p183_p1 = scmp.eq.s32.totalorder %s182_s9, 0  ;;  %p196_p2 = scmp.eq.s32.totalorder %s1523_s28, 1 }
   0x8   : > { %p201_p3 = scmp.ne.s32.totalorder %s1437_s25, %s1433_s24  ;;  %p202_p4 = scmp.eq.s32.totalorder %s1107_s29, 1 }
   0x9   : > { %s1538_s10 = scalar_select %p183_p1, %s1441_s26, %s185_s8  }
   0xa   : > { %p1540_p5 = por %p196_p2, %p195_p0  ;;  %p1544_p6 = por %p202_p4, %p201_p3 }
   0xb   : > { %p1108_p7 = scmp.ge.s32.totalorder %s1445_s27, 1  ;;  %p209_p8 = scmp.lt.s32.totalorder %s1445_s27, 3 }
   0xc   : > { %s1866_s11 = scalar_select %p1540_p5, 1, 0 }
   0xd   : > { %s1867_s12 = scalar_select %p1544_p6, 1, 0 }
   0xe   : > { %p1862_p9 = scmp.eq.s32.totalorder %s1523_s28, 0  ;;  %p1551_p10 = pnand %p1108_p7, %p209_p8 }
   0xf   : > { %s1447_s14 = smov [#allocation5]   ;;  %s1351_s19 = scalar_lea.hbm %s1856_s2, 2048 }
  0x10   : > { %s1868_s13 = scalar_select %p1551_p10, 1, 0 }
  0x11   : > { %s221_s15 = sshll.u32 %s1447_s14, 4  ;;  %p1222_p11 = pneg %p1551_p10  ;;  %s222_s15 = int_to_ptr.vmem [resolvable:$true] %s221_s15 }
  0x12   : > { %p1352_p13 = scmp.ne.s32.totalorder %s1856_s2, %s1351_s19  ;;  %p1358_p3 = scmp.lt.u32.totalorder %s1351_s19, %s1856_s2 }
  0x13   : > { %p1559_p12 = pnand %p1862_p9, %p1222_p11 }
  0x15   : > { %p1353_p0 = pneg %p1559_p12 }
  0x17   : > { %p1354_p1 = pnand %p1353_p0, %p1352_p13 }
  0x19   : > { %p1355_p2 = pneg %p1354_p1 }
  0x1b   : > { %p1360_p4 = pnand %p1358_p3, %p1355_p2 }
  0x1d   : > { %1363 = shalt.err (!%p1360_p4)
}
  0x1e   : > { %s1364_s29 = scalar_lea.vmem %s222_s15, 2048  ;;  %p1372_p9 = scmp.lt.s32.totalorder %s222_s15, %s222_s15 }
  0x1f   : > { %p1365_p7 = scmp.ne.s32.totalorder %s222_s15, %s1364_s29  ;;  %p1373_p6 = scmp.lt.s32.totalorder %s1364_s29, %s1364_s29 }
  0x21   : > { %p1367_p8 = pnand %p1365_p7, %p1353_p0  ;;  %p1374_p5 = por %p1373_p6, %p1372_p9 }
  0x23   : > { %p1368_p11 = pneg %p1367_p8 }
  0x25   : > { %p1375_p10 = pnand %p1374_p5, %p1368_p11 }
  0x27   : > { %1378 = shalt.err (!%p1375_p10)
}
  0x28   : > { %s1448_s8 = smov 256   ;;  %s1449_s9 = smov 16  }
  0x29   : > { %1225 = dma.hbm_to_vmem [thread:$0]  (!%p1559_p12), %s1856_s2, 2048, %s222_s15, [#allocation6], %s1448_s8, %s1448_s8, %s1449_s9  }
  0x2a   : > { %p1870_p13 = scmp.ne.s32.totalorder %s1868_s13, 0 }
  0x2b   : > { %p1871_p1 = scmp.eq.s32.totalorder (!%p1870_p13), %s1523_s28, 0 }
  0x2c   : > { %264 = sbr.rel (%p1870_p13) target bundleno = 1032 (0x408), region = 48 }
  0x33   : > { %1424 = dma.done.wait (%p1871_p1), [#allocation6], 2048   ;;  %p1872_p0 = pmov %p1871_p1 }
  0x34   : > { %v1450_v0 = vmov 0.0   ;;  %p300_p5 = scmp.lt.s32.totalorder %s1523_s28, 1  ;;  %v360_v1 = vld [vmem:[#allocation5 + $0x8] sm:$0xff]  ;;  %v362_v2 = vld [vmem:[#allocation5 + $0x18] sm:$0xff]  ;;  %v359_v3 = vld [vmem:[#allocation5] sm:$0xff]  ;;  %vm375_vm0 = vcmask 523264   ;;  %v309_v37 = vlaneseq }
  0x35   : > { %1426 = vsyncadd (%p1872_p0), [#allocation6], 4294965248  ;;  %443 = vmatprep.mubr.f32.mxu0 %v1450_v0  ;;  %356 = vst [vmem:[#allocation2 + $0x8] sm:$0xc0] %v1450_v0  ;;  %735 = vmatprep.mubr.f32.mxu1 %v1450_v0  ;;  %v1152_v4 = vpack.c.bf16 %v362_v2, %v360_v1  ;;  %v361_v5 = vld [vmem:[#allocation5 + $0x10] sm:$0xff]  ;;  %v364_v6 = vld [vmem:[#allocation5 + $0x28] sm:$0xff] }
  0x36   : > { %357 = vst [vmem:[#allocation2 + $0x10] sm:$0xc0] %v1450_v0  ;;  %s1591_s13 = scalar_select %p300_p5, %s1523_s28, 1  ;;  %v366_v7 = vld [vmem:[#allocation5 + $0x38] sm:$0xff]  ;;  %v1154_v8 = vpack.c.bf16 %v361_v5, %v359_v3  ;;  %v363_v10 = vld [vmem:[#allocation5 + $0x20] sm:$0xff]  ;;  %v365_v11 = vld [vmem:[#allocation5 + $0x30] sm:$0xff] }
  0x37   : > { %v1156_v9 = vpack.c.bf16 %v366_v7, %v364_v6  ;;  %v368_v12 = vld [vmem:[#allocation5 + $0x48] sm:$0xff]  ;;  %1153 = vmatprep.subr.bf16.mxu0 %v1152_v4  ;;  %v370_v13 = vld [vmem:[#allocation5 + $0x58] sm:$0xff]  ;;  %v1158_v14 = vpack.c.bf16 %v365_v11, %v363_v10  ;;  %v367_v16 = vld [vmem:[#allocation5 + $0x40] sm:$0xff]  ;;  %s1451_s23 = smov 17   ;;  %s1452_s29 = smov 15   ;;  %v1459_v35 = vmov 0  }
  0x38   : > { %s1114_s15 = sshll.u32 %s1591_s13, 2  ;;  %1155 = vmatpush1.bf16.msra.mxu0 %v1154_v8  ;;  %v1160_v15 = vpack.c.bf16 %v370_v13, %v368_v12  ;;  %v369_v17 = vld [vmem:[#allocation5 + $0x50] sm:$0xff]  ;;  %v372_v18 = vld [vmem:[#allocation5 + $0x68] sm:$0xff]  ;;  %v374_v19 = vld [vmem:[#allocation5 + $0x78] sm:$0xff]  ;;  %476 = vrot.lane.b32.xlu1 %v1450_v0, %s1451_s23  ;;  %s1453_s8 = smov 16   ;;  %v310_v38 = vand.u32 127, %v309_v37 }
  0x39   : > { %s308_s19 = scalar_lea.vmem %s1855_s1, %s1114_s15  ;;  %1157 = vmatprep.subr.bf16.mxu0 %v1156_v9  ;;  %v1162_v22 = vpack.c.bf16 %v369_v17, %v367_v16  ;;  %v1164_v23 = vpack.c.bf16 %v374_v19, %v372_v18  ;;  %v371_v24 = vld [vmem:[#allocation5 + $0x60] sm:$0xff]  ;;  %v373_v25 = vld [vmem:[#allocation5 + $0x70] sm:$0xff]  ;;  %s303_s22 = scalar_lea.vmem %s1854_s0, %s1114_s15  ;;  %520 = vrot.lane.b32.xlu0 %v1450_v0, %s1452_s29  ;;  %vm482_vm1 = vcmask 138240   ;;  %vm503_vm3 = vcmask 130048  }
  0x3a   : > { %v1118_v20 = vld.sshfl [vmem:[%s308_s19] sm:$0x33 pattern:$0x76325410]  ;;  %v1166_v26 = vpack.c.bf16 %v373_v25, %v371_v24  ;;  %s1454_s9 = smov 1   ;;  %s1455_s14 = smov 127   ;;  %1314 = vset.pattern.permute.xlu1 %v1459_v35  ;;  %1350 = vset.pattern.permute.xlu0 %v1459_v35 }
  0x3b   : > { %v461_v21 = vcombine.low %v1118_v20, %v1118_v20  ;;  %465 = vst [vmem:[#allocation2 + $0x10] sm:$0x30] %v1118_v20  ;;  %v358_v27 = vld [vmem:[%s303_s22] sm:$0xf]  ;;  %s1456_s17 = smov 112   ;;  %s1457_s13 = smov 113  }
  0x3c   : > { %1159 = vmatpush1.bf16.msra.mxu0 %v1158_v14  ;;  %497 = vrot.lane.b32.xlu1 %v1450_v0, %s1453_s8  ;;  %s1458_s15 = smov 111   ;;  %v661_v34 = vld [vmem:[%s1858_s4] sm:$0xff]  ;;  %v311_v40 = vadd.s32 128, %v310_v38  ;;  %v316_v44 = vand.u32 15, %v310_v38  ;;  %vm547_vm5 = vcmask 7168   ;;  %vm1460_vm6 = vmmov 1  }
  0x3d   : > { %1161 = vmatprep.subr.bf16.mxu0 %v1160_v15  ;;  %464 = vst [vmem:[#allocation2 + $0x8] sm:$0x30] %v461_v21  ;;  %vm526_vm8 = vcmask 121856   ;;  %vm572_vm14 = vcmask 1039360   ;;  %p1887_p9 = scmp.ne.s32.totalorder %s1866_s11, 0 }
  0x3e   : > { %v323_v43 = vand.u32 15, %v311_v40  ;;  %v336_v47 = vadd.s32 4294967295, %v316_v44  ;;  %v1649_v55 = vadd.s32 1, %v316_v44 }
  0x40   : > { %1163 = vmatpush1.bf16.msra.mxu0 %v1162_v22  ;;  %541 = vrot.lane.b32.xlu1 %v1450_v0, %s1454_s9  ;;  %v337_v46 = vadd.s32 4294967295, %v323_v43  ;;  %v1647_v52 = vadd.s32 1, %v323_v43  ;;  %vm338_vm4 = vcmp.ge.s32.totalorder %v336_v47, 0  ;;  %vm348_vm11 = vcmp.lt.s32.totalorder %v1649_v55, 16  ;;  %v642_v43 = vld [vmem:[%s1857_s3] sm:$0xff] }
  0x41   : > { %1165 = vmatprep.subr.bf16.mxu0 %v1164_v23  ;;  %vm1663_vm9 = vmpackc.low %vm1460_vm6, %vm338_vm4 }
  0x42   : > { %vm339_vm2 = vcmp.ge.s32.totalorder %v337_v46, 0  ;;  %vm349_vm10 = vcmp.lt.s32.totalorder %v1647_v52, 16  ;;  %vm1687_vm13 = vmpackc.low %vm338_vm4, %vm348_vm11 }
  0x43   : > { %vm1655_vm7 = vmpackc.low %vm1460_vm6, %vm339_vm2 }
  0x44   : > { %1167 = vmatpush1.bf16.msra.mxu0 %v1166_v26  ;;  %vm1680_vm12 = vmpackc.low %vm339_vm2, %vm349_vm10  ;;  %vm1865_vm2 = vcmask 924672  }
  0x45   : > { %vm1700_vm15 = vmpackc.low %vm349_vm10, %vm1460_vm6 }
  0x46   : > { %vm1709_vm4 = vmpackc.low %vm348_vm11, %vm1460_vm6  ;;  %vm633_vm6 = vcmask 908288  }
  0x47   : > { %1117 = vmatmul.mubr.msk.f32.vlgmr.msra.gmra.mrb[0].mxu0 %vm375_vm0, %v358_v27  ;;  %vm614_vm0 = vcmask 916480  }
  0x48   : > { %998 = vmatprep.mubr.f32.mxu0 %v1450_v0 }
  0xaa   : > { %v477_v36 = vpop.permute.xlu1 %476 }
  0xab   : > { %v521_v41 = vpop.permute.xlu0 %520 }
  0xae   : > { %v498_v39 = vpop.permute.xlu1 %497 }
  0xb2   : > { %v542_v42 = vpop.permute.xlu1 %541 }
 0x11a   : > { %v445_v28 = vpop.f32.mrb[0].mxu0 }
 0x11b   : > { %450 = vst [vmem:[#allocation2 + $0x8] sm:$0xf] %v445_v28  ;;  %v447_v29 = vpop.f32.mrb[1].mxu0 }
 0x11c   : > { %451 = vst [vmem:[#allocation2 + $0x10] sm:$0xf] %v447_v29 }
 0x122   : > { %v1609_v30 = vld [vmem:[#allocation2 + $0x8] sm:$0xff] }
 0x123   : > { %v1611_v31 = vld [vmem:[#allocation2 + $0x10] sm:$0xff] }
 0x124   : > { %v1279_v32 = vpack.i.bf16 %v1611_v31, %v1609_v30  ;;  %v1309_v33 = vpack.i.bf16 %v1450_v0, %v1611_v31 }
 0x126   : > { %1280 = vrot.lane.b32.xlu0 %v1279_v32, %s1451_s23  ;;  %1295 = vrot.lane.b32.xlu1 %v1279_v32, %s1454_s9 }
 0x12a   : > { %1285 = vrot.lane.b32.xlu0 %v1279_v32, %s1453_s8  ;;  %566 = vrot.lane.b32.xlu1 %v1609_v30, %s1455_s14 }
 0x12e   : > { %1290 = vrot.lane.b32.xlu0 %v1279_v32, %s1452_s29  ;;  %1310 = vrot.lane.b32.xlu1 %v1309_v33, %s1456_s17 }
 0x132   : > { %587 = vrot.lane.b32.xlu0 %v1609_v30, %s1457_s13  ;;  %608 = vrot.lane.b32.xlu1 %v1609_v30, %s1456_s17 }
 0x136   : > { %1300 = vrot.lane.b32.xlu0 %v1309_v33, %s1455_s14  ;;  %631 = vrot.lane.b32.xlu1 %v1450_v0, %s1458_s15 }
 0x13a   : > { %1305 = vrot.lane.b32.xlu0 %v1309_v33, %s1457_s13  ;;  %664 = vperm.xlu1 %1314, %v661_v34  }
 0x13e   : > { %629 = vrot.lane.b32.xlu0 %v1611_v31, %s1458_s15  ;;  %772 = vrot.lane.b32.xlu1 %v1450_v0, %s1453_s8 }
 0x142   : > { %627 = vrot.lane.b32.xlu0 %v1609_v30, %s1458_s15  ;;  %810 = vrot.lane.b32.xlu1 %v1450_v0, %s1454_s9 }
 0x146   : > { %752 = vrot.lane.b32.xlu0 %v1450_v0, %s1451_s23 }
 0x14a   : > { %790 = vrot.lane.b32.xlu0 %v1450_v0, %s1452_s29 }
 0x198   : > { %v1281_v45 = vpop.permute.xlu0 %1280  ;;  %v1296_v48 = vpop.permute.xlu1 %1295 }
 0x199   : > { %v1283_v49 = vunpack.i.h.bf16 %v1281_v45  ;;  %v1282_v50 = vunpack.i.l.bf16 %v1281_v45  ;;  %v1298_v56 = vunpack.i.h.bf16 %v1296_v48  ;;  %v1297_v57 = vunpack.i.l.bf16 %v1296_v48 }
 0x19b   : > { %v484_v58 = vsel %vm482_vm1, %v1282_v50, %v1283_v49  ;;  %v483_v61 = vsel %vm482_vm1, %v477_v36, %v1282_v50  ;;  %v548_v7 = vsel %vm547_vm5, %v542_v42, %v1297_v57  ;;  %v549_v8 = vsel %vm547_vm5, %v1297_v57, %v1298_v56 }
 0x19c   : > { %v1286_v51 = vpop.permute.xlu0 %1285  ;;  %v567_v63 = vpop.permute.xlu1 %566 }
 0x19d   : > { %v1288_v53 = vunpack.i.h.bf16 %v1286_v51  ;;  %v1287_v54 = vunpack.i.l.bf16 %v1286_v51 }
 0x19f   : > { %v505_v59 = vsel %vm503_vm3, %v1287_v54, %v1288_v53  ;;  %v504_v62 = vsel %vm503_vm3, %v498_v39, %v1287_v54  ;;  %v925_v54 = vld [vmem:[%s1860_s6] sm:$0xff] }
 0x1a0   : > { %v1291_v1 = vpop.permute.xlu0 %1290  ;;  %v1168_v2 = vpack.c.bf16 %v505_v59, %v484_v58  ;;  %v1171_v3 = vpack.c.bf16 %v504_v62, %v483_v61  ;;  %v1311_v16 = vpop.permute.xlu1 %1310 }
 0x1a1   : > { %v1293_v5 = vunpack.i.h.bf16 %v1291_v1  ;;  %v1292_v6 = vunpack.i.l.bf16 %v1291_v1  ;;  %v1313_v20 = vunpack.i.h.bf16 %v1311_v16  ;;  %v1312_v21 = vunpack.i.l.bf16 %v1311_v16 }
 0x1a2   : > { %1170 = vmatprep.subr.msk.bf16.mxu1 %vm1655_vm7, %v1168_v2 }
 0x1a3   : > { %v527_v9 = vsel %vm526_vm8, %v521_v41, %v1292_v6  ;;  %v528_v10 = vsel %vm526_vm8, %v1292_v6, %v1293_v5  ;;  %1173 = vmatpush1.bf16.msk.msra.mxu1 %vm1663_vm9, %v1171_v3  ;;  %v616_v35 = vsel %vm614_vm0, %v1312_v21, %v1313_v20 }
 0x1a4   : > { %v1174_v12 = vpack.c.bf16 %v549_v8, %v528_v10  ;;  %v1177_v13 = vpack.c.bf16 %v548_v7, %v527_v9  ;;  %v588_v14 = vpop.permute.xlu0 %587  ;;  %v609_v25 = vpop.permute.xlu1 %608 }
 0x1a5   : > { %v615_v34 = vsel %vm614_vm0, %v609_v25, %v1312_v21 }
 0x1a6   : > { %1176 = vmatprep.subr.msk.bf16.mxu1 %vm1680_vm12, %v1174_v12 }
 0x1a7   : > { %1179 = vmatpush1.bf16.msk.msra.mxu1 %vm1687_vm13, %v1177_v13 }
 0x1a8   : > { %v1301_v17 = vpop.permute.xlu0 %1300  ;;  %v632_v38 = vpop.permute.xlu1 %631 }
 0x1a9   : > { %v1303_v18 = vunpack.i.h.bf16 %v1301_v17  ;;  %v1302_v19 = vunpack.i.l.bf16 %v1301_v17 }
 0x1ab   : > { %v573_v22 = vsel %vm572_vm14, %v567_v63, %v1302_v19  ;;  %v574_v23 = vsel %vm572_vm14, %v1302_v19, %v1303_v18 }
 0x1ac   : > { %v1180_v26 = vpack.c.bf16 %v574_v23, %v1611_v31  ;;  %v1183_v27 = vpack.c.bf16 %v573_v22, %v1609_v30  ;;  %v1306_v28 = vpop.permute.xlu0 %1305 }
 0x1ad   : > { %v1308_v32 = vunpack.i.h.bf16 %v1306_v28  ;;  %v1307_v33 = vunpack.i.l.bf16 %v1306_v28 }
 0x1ae   : > { %1182 = vmatprep.subr.msk.bf16.mxu1 %vm1700_vm15, %v1180_v26 }
 0x1af   : > { %v594_v31 = vsel %vm1865_vm2, %v588_v14, %v1307_v33  ;;  %v595_v30 = vsel %vm1865_vm2, %v1307_v33, %v1308_v32  ;;  %1185 = vmatpush1.bf16.msk.msra.mxu1 %vm1709_vm4, %v1183_v27  ;;  %vm667_vm2 = vcmask 588800  }
 0x1b0   : > { %v1189_v36 = vpack.c.bf16 %v615_v34, %v594_v31  ;;  %v630_v37 = vpop.permute.xlu0 %629  ;;  %v1186_v39 = vpack.c.bf16 %v616_v35, %v595_v30 }
 0x1b1   : > { %v635_v40 = vsel %vm633_vm6, %v630_v37, %v632_v38 }
 0x1b2   : > { %1188 = vmatprep.subr.msk.bf16.mxu1 %vm1655_vm7, %v1186_v39 }
 0x1b3   : > { %1191 = vmatpush1.bf16.msk.msra.mxu1 %vm1663_vm9, %v1189_v36 }
 0x1b4   : > { %v628_v41 = vpop.permute.xlu0 %627  ;;  %1138 = vmatprep.subr.msk.mxu1 %vm349_vm10, %v635_v40 }
 0x1b5   : > { %v634_v42 = vsel %vm633_vm6, %v628_v41, %v630_v37 }
 0x1b7   : > { %1139 = vmatpush1.msk.msra.mxu1 %vm348_vm11, %v634_v42 }
 0x1b8   : > { %1119 = vmatmul.mubr.msk.f32.vlgmr.msra.gmra.mrb[0].mxu1 %vm667_vm2, %v642_v43  ;;  %v753_v56 = vpop.permute.xlu0 %752 }
 0x1b9   : > { %v665_v44 = vpop.permute.xlu1 %664 }
 0x1bc   : > { %v791_v58 = vpop.permute.xlu0 %790 }
 0x1bd   : > { %v773_v57 = vpop.permute.xlu1 %772 }
 0x1c1   : > { %v811_v59 = vpop.permute.xlu1 %810 }
 0x28b   : > { %v737_v45 = vpop.f32.mrb[0].mxu1 }
 0x28c   : > { %v738_v46 = vadd.f32 %v737_v45, %v665_v44  ;;  %v739_v47 = vpop.f32.mrb[1].mxu1 }
 0x28d   : > { %v740_v48 = vadd.f32 %v739_v47, %v665_v44 }
 0x28e   : > { %v1735_v49 = vmax.f32 %v738_v46, 0.0 }
 0x28f   : > { %v1737_v50 = vmax.f32 %v740_v48, 0.0 }
 0x291   : > { %v1320_v51 = vpack.i.bf16 %v1737_v50, %v1735_v49  ;;  %v1345_v53 = vpack.i.bf16 %v1450_v0, %v1737_v50 }
 0x293   : > { %1321 = vrot.lane.b32.xlu1 %v1320_v51, %s1453_s8  ;;  %1316 = vrot.lane.b32.xlu0 %v1320_v51, %s1451_s23  ;;  %s297_s8 = sand.u32 1, %s1437_s25  }
 0x294   : > { %s1010_s19 = scalar_lea.sflag [#allocation7], %s297_s8 }
 0x297   : > { %1331 = vrot.lane.b32.xlu1 %v1320_v51, %s1454_s9  ;;  %1326 = vrot.lane.b32.xlu0 %v1320_v51, %s1452_s29  ;;  %s1113_s9 = sshll.u32 %s297_s8, 4 }
 0x29b   : > { %834 = vrot.lane.b32.xlu1 %v1735_v49, %s1455_s14  ;;  %854 = vrot.lane.b32.xlu0 %v1735_v49, %s1457_s13 }
 0x29f   : > { %1346 = vrot.lane.b32.xlu1 %v1345_v53, %s1456_s17  ;;  %1336 = vrot.lane.b32.xlu0 %v1345_v53, %s1455_s14  ;;  %s1127_s14 = sshll.u32 %s1523_s28, 8  ;;  %s1461_s28 = smov [#allocation8]  }
 0x2a0   : > { %s1812_s18 = scalar_lea.hbm %s1861_s7, %s1127_s14  ;;  %s1383_s21 = sshll.u32 %s1461_s28, 4  ;;  %s1384_s21 = int_to_ptr.vmem [resolvable:$false] %s1383_s21 }
 0x2a1   : > { %s1385_s22 = scalar_lea.vmem %s1384_s21, 512 }
 0x2a3   : > { %874 = vrot.lane.b32.xlu1 %v1735_v49, %s1456_s17  ;;  %1341 = vrot.lane.b32.xlu0 %v1345_v53, %s1457_s13  ;;  %s299_s17 = scalar_lea.vmem [#allocation8], %s1113_s9 }
 0x2a4   : > { %s1024_s13 = sshll.u32 %s299_s17, 4  ;;  %s1814_s13 = int_to_ptr.vmem [resolvable:$true] %s1024_s13 }
 0x2a5   : > { %s1379_s20 = scalar_lea.vmem %s1814_s13, 256  ;;  %p1386_p2 = scmp.lt.s32.totalorder %s1814_s13, %s1384_s21 }
 0x2a6   : > { %p1380_p6 = scmp.ne.s32.totalorder %s1814_s13, %s1379_s20  ;;  %p1387_p3 = scmp.lt.s32.totalorder %s1385_s22, %s1379_s20 }
 0x2a7   : > { %896 = vrot.lane.b32.xlu1 %v1450_v0, %s1458_s15  ;;  %894 = vrot.lane.b32.xlu0 %v1737_v50, %s1458_s15 }
 0x2a8   : > { %p1381_p10 = pnand %p1380_p6, %p1887_p9  ;;  %p1388_p4 = por %p1387_p3, %p1386_p2 }
 0x2aa   : > { %p1382_p12 = pneg %p1381_p10 }
 0x2ab   : > { %928 = vperm.xlu1 %1314, %v925_v54   ;;  %892 = vrot.lane.b32.xlu0 %v1735_v49, %s1458_s15 }
 0x2ac   : > { %p1389_p7 = pnand %p1388_p4, %p1382_p12 }
 0x305   : > { %v1322_v61 = vpop.permute.xlu1 %1321  ;;  %v1317_v62 = vpop.permute.xlu0 %1316 }
 0x306   : > { %v1324_v63 = vunpack.i.h.bf16 %v1322_v61  ;;  %v1323_v1 = vunpack.i.l.bf16 %v1322_v61  ;;  %v1319_v0 = vunpack.i.h.bf16 %v1317_v62  ;;  %v1318_v2 = vunpack.i.l.bf16 %v1317_v62 }
 0x308   : > { %v778_v3 = vsel %vm503_vm3, %v773_v57, %v1323_v1  ;;  %v779_v5 = vsel %vm503_vm3, %v1323_v1, %v1324_v63  ;;  %v758_v6 = vsel %vm482_vm1, %v753_v56, %v1318_v2  ;;  %v759_v7 = vsel %vm482_vm1, %v1318_v2, %v1319_v0 }
 0x309   : > { %v1192_v8 = vpack.c.bf16 %v779_v5, %v759_v7  ;;  %v1195_v9 = vpack.c.bf16 %v778_v3, %v758_v6  ;;  %v1332_v10 = vpop.permute.xlu1 %1331  ;;  %v1327_v12 = vpop.permute.xlu0 %1326  ;;  %vm1885_vm1 = vcmask 924672  }
 0x30a   : > { %v1334_v13 = vunpack.i.h.bf16 %v1332_v10  ;;  %v1333_v14 = vunpack.i.l.bf16 %v1332_v10  ;;  %v1329_v16 = vunpack.i.h.bf16 %v1327_v12  ;;  %v1328_v17 = vunpack.i.l.bf16 %v1327_v12  ;;  %vm1886_vm3 = vmmov %vm1885_vm1 }
 0x30b   : > { %1194 = vmatprep.subr.msk.bf16.mxu0 %vm1655_vm7, %v1192_v8 }
 0x30c   : > { %v816_v18 = vsel %vm547_vm5, %v811_v59, %v1333_v14  ;;  %v817_v19 = vsel %vm547_vm5, %v1333_v14, %v1334_v13  ;;  %v796_v20 = vsel %vm526_vm8, %v791_v58, %v1328_v17  ;;  %v797_v21 = vsel %vm526_vm8, %v1328_v17, %v1329_v16  ;;  %1197 = vmatpush1.bf16.msk.msra.mxu0 %vm1663_vm9, %v1195_v9 }
 0x30d   : > { %v1198_v22 = vpack.c.bf16 %v817_v19, %v797_v21  ;;  %v1201_v23 = vpack.c.bf16 %v816_v18, %v796_v20  ;;  %v835_v25 = vpop.permute.xlu1 %834  ;;  %v855_v26 = vpop.permute.xlu0 %854 }
 0x30f   : > { %1200 = vmatprep.subr.msk.bf16.mxu0 %vm1680_vm12, %v1198_v22 }
 0x310   : > { %1203 = vmatpush1.bf16.msk.msra.mxu0 %vm1687_vm13, %v1201_v23 }
 0x311   : > { %v1347_v27 = vpop.permute.xlu1 %1346  ;;  %v1337_v28 = vpop.permute.xlu0 %1336 }
 0x312   : > { %v1339_v32 = vunpack.i.h.bf16 %v1337_v28  ;;  %v1338_v33 = vunpack.i.l.bf16 %v1337_v28  ;;  %v1349_v34 = vunpack.i.h.bf16 %v1347_v27  ;;  %v1348_v31 = vunpack.i.l.bf16 %v1347_v27 }
 0x314   : > { %v840_v30 = vsel %vm572_vm14, %v835_v25, %v1338_v33  ;;  %v841_v35 = vsel %vm572_vm14, %v1338_v33, %v1339_v32  ;;  %v881_v15 = vsel %vm614_vm0, %v1348_v31, %v1349_v34 }
 0x315   : > { %v1204_v36 = vpack.c.bf16 %v841_v35, %v1737_v50  ;;  %v1207_v37 = vpack.c.bf16 %v840_v30, %v1735_v49  ;;  %v875_v38 = vpop.permute.xlu1 %874  ;;  %v1342_v11 = vpop.permute.xlu0 %1341  ;;  %v906_v49 = vld [vmem:[%s1859_s5] sm:$0xff] }
 0x316   : > { %v1344_v39 = vunpack.i.h.bf16 %v1342_v11  ;;  %v1343_v40 = vunpack.i.l.bf16 %v1342_v11  ;;  %v880_v41 = vsel %vm614_vm0, %v875_v38, %v1348_v31 }
 0x317   : > { %1206 = vmatprep.subr.msk.bf16.mxu0 %vm1700_vm15, %v1204_v36 }
 0x318   : > { %v860_v42 = vsel %vm1885_vm1, %v855_v26, %v1343_v40  ;;  %v861_v43 = vsel %vm1886_vm3, %v1343_v40, %v1344_v39  ;;  %1209 = vmatpush1.bf16.msk.msra.mxu0 %vm1709_vm4, %v1207_v37 }
 0x319   : > { %v1210_v44 = vpack.c.bf16 %v881_v15, %v861_v43  ;;  %v1213_v45 = vpack.c.bf16 %v880_v41, %v860_v42  ;;  %v897_v46 = vpop.permute.xlu1 %896  ;;  %v895_v47 = vpop.permute.xlu0 %894 }
 0x31a   : > { %v899_v24 = vsel %vm633_vm6, %v895_v47, %v897_v46 }
 0x31b   : > { %1212 = vmatprep.subr.msk.bf16.mxu0 %vm1655_vm7, %v1210_v44 }
 0x31c   : > { %1215 = vmatpush1.bf16.msk.msra.mxu0 %vm1663_vm9, %v1213_v45 }
 0x31d   : > { %v893_v48 = vpop.permute.xlu0 %892  ;;  %1150 = vmatprep.subr.msk.mxu0 %vm349_vm10, %v899_v24 }
 0x31e   : > { %v898_v29 = vsel %vm633_vm6, %v893_v48, %v895_v47 }
 0x320   : > { %1151 = vmatpush1.msk.msra.mxu0 %vm348_vm11, %v898_v29 }
 0x321   : > { %1120 = vmatmul.mubr.msk.f32.vlgmr.msra.gmra.mrb[2].mxu0 %vm667_vm2, %v906_v49 }
 0x32a   : > { %v929_v60 = vpop.permute.xlu1 %928 }
 0x3f4   : > { %v1000_v4 = vpop.f32.mrb[2].mxu0 }
 0x3f5   : > { %v1001_v50 = vadd.f32 %v1000_v4, %v929_v60  ;;  %v1002_v51 = vpop.f32.mrb[3].mxu0 }
 0x3f6   : > { %v1003_v52 = vadd.f32 %v1002_v51, %v929_v60 }
 0x3f7   : > { %v1005_v53 = vmax.f32 %v1001_v50, 0.0 }
 0x3f8   : > { %v1006_v54 = vmax.f32 %v1003_v52, 0.0 }
 0x3f9   : > { %1007 = vst [vmem:[%s299_s17] sm:$0xff] %v1005_v53 }
 0x3fa   : > { %1008 = vst [vmem:[%s299_s17 + $0x8] sm:$0xff] %v1006_v54 }
 0x3fb   : > { %1392 = shalt.err (!%p1389_p7)
}
 0x3fc   : > { %s1393_s23 = scalar_lea.hbm %s1812_s18, 256  ;;  %s1397_s9 = scalar_lea.hbm %s1861_s7, 512 }
 0x3fd   : > { %p1394_p8 = scmp.ne.s32.totalorder %s1812_s18, %s1393_s23  ;;  %p1398_p1 = scmp.lt.u32.totalorder %s1812_s18, %s1861_s7 }
 0x3fe   : > { %p1399_p0 = scmp.lt.u32.totalorder %s1397_s9, %s1393_s23  ;;  %p1401_p6 = scmp.lt.u32.totalorder %s1393_s23, %s1812_s18 }
 0x3ff   : > { %p1395_p11 = pnand %p1394_p8, %p1887_p9 }
 0x400   : > { %p1400_p5 = por %p1399_p0, %p1398_p1 }
 0x401   : > { %p1396_p13 = pneg %p1395_p11 }
 0x402   : > { %p1402_p10 = por %p1401_p6, %p1400_p5 }
 0x404   : > { %p1403_p12 = pnand %p1402_p10, %p1396_p13 }
 0x406   : > { %1406 = shalt.err (!%p1403_p12)
}
 0x407   : > { %1220 = dma.vmem_to_hbm [thread:$0]  (%p1887_p9), %s1814_s13, 256, %s1812_s18, %s1010_s19  }
 0x408 PF: > { %p1232_p2 = scmp.ge.s32.totalorder %s1445_s27, 2  ;;  %s1036_s15 = sand.u32 1, %s1433_s24  }
 0x409   : > { %p1888_p3 = scmp.ne.s32.totalorder %s1867_s12, 0  ;;  %s1037_s16 = scalar_lea.sflag [#allocation7], %s1036_s15 }
 0x40b   : > { %p1227_p4 = pnand %p1232_p2, %p1888_p3 }
 0x40d   : > { %1428 = dma.done.wait (!%p1227_p4), %s1037_s16, 256  }
 0x40e   : > { %1430 = vsyncadd (!%p1227_p4), %s1037_s16, 4294967040  ;;  %p18_p7 = scmp.ge.s32.totalorder %s1527_s30, 4   ;;  %s1889_s24 = smov %s1437_s25 }
 0x40f   : > { %s1890_s25 = smov %s1441_s26  ;;  %s1891_s26 = smov %s1538_s10 }
 0x410   : > { %s1892_s27 = smov %s1527_s30  ;;  %20 = sbr.rel (!%p18_p7) target bundleno = 4 (0x4), region = 91 }
 0x417   :  { %1042 = vsyncpa [#allocation6], 1 }
 0x418   :  { %1044 = vsyncpa [#allocation6 + $0x1], 1 }
 0x419   :  { %1045 = vsyncpa [#allocation7], 1 }
 0x41a   :  { %1047 = vsyncpa [#allocation7 + $0x1], 1 }

</bundles_post_ra>
